<compile_context>
chip_gen: v5e
topology: v5e:2x2
jax: 0.10.0
libtpu: 0.0.40
codegen_flags: <defaults>
</compile_context>

<pallas_src>
import jax
import jax.numpy as jnp
from jax import lax
from jax.experimental import pallas as pl
from jax.experimental.pallas import tpu as pltpu

EPS = 1e-5                      # PyTorch BatchNorm2d default eps
LANE = 128                      # pad channel dims to a multiple of the lane width
MM_DTYPE = jnp.bfloat16         # MXU operand dtype (f32 accumulation)
_VMEM_LIMIT = 64 * 1024 * 1024
_TAPS = tuple((kh, kw) for kh in range(3) for kw in range(3))


def _round_up(v, m):
    return (v + m - 1) // m * m


# ---------------------------------------------------------------------------
# Kernel 1: single-pass per-channel batch statistics of x and relu(x).
# Grid over images ("arbitrary"); sums accumulated in a VMEM scratch and
# written once at the last step.
# ---------------------------------------------------------------------------
def _stats_kernel(xp_ref, sums_ref, acc_ref):
    n = pl.program_id(0)
    cin_p = xp_ref.shape[-1]
    x = xp_ref[...].reshape(-1, cin_p)
    r = jnp.maximum(x, 0.0)

    @pl.when(n == 0)
    def _init():
        acc_ref[...] = jnp.zeros_like(acc_ref)

    acc_ref[...] += jnp.concatenate(
        [jnp.sum(x, axis=0, keepdims=True),
         jnp.sum(x * x, axis=0, keepdims=True),
         jnp.sum(r, axis=0, keepdims=True),
         jnp.sum(r * r, axis=0, keepdims=True)], axis=0)

    @pl.when(n == pl.num_programs(0) - 1)
    def _finalize():
        sums_ref[...] = acc_ref[...]


# ---------------------------------------------------------------------------
# Kernel 2: fused bn1+relu prologue -> 3x3 stride-2 conv as 9 tap matmuls,
# plus single-pass per-channel sum/sumsq of the conv output (for bn2).
# The stride-2 taps read contiguous windows of zero-padded parity planes.
# ---------------------------------------------------------------------------
def _conv1_kernel(xp_ref, coef1_ref, w1_ref, y_ref, ysums_ref,
                  par_ref, acc_ref, ys_acc_ref):
    n = pl.program_id(0)
    oh, ow = y_ref.shape[1], y_ref.shape[2]
    cin_p, cout_p = xp_ref.shape[-1], y_ref.shape[-1]

    scale1 = coef1_ref[0:1, :]
    shift1 = coef1_ref[1:2, :]

    @pl.when(n == 0)
    def _init():
        par_ref[...] = jnp.zeros_like(par_ref)        # halo rows/cols stay zero
        ys_acc_ref[...] = jnp.zeros_like(ys_acc_ref)

    # a = relu(bn1(x)) written per spatial parity into top/left zero-padded planes.
    for pr in range(2):
        for pc in range(2):
            a = jnp.maximum(xp_ref[2 * pr + pc] * scale1 + shift1, 0.0)
            par_ref[2 * pr + pc, 1:, 1:, :] = a

    # 3x3 / stride-2 / pad-1 conv: tap (kh, kw) -> contiguous window of a parity plane.
    for t, (kh, kw) in enumerate(_TAPS):
        pr = 0 if kh == 1 else 1
        pc = 0 if kw == 1 else 1
        rs = 0 if kh == 0 else 1
        cs = 0 if kw == 0 else 1
        lhs = par_ref[2 * pr + pc, rs:rs + oh, cs:cs + ow, :]
        lhs = lhs.reshape(oh * ow, cin_p).astype(MM_DTYPE)
        contrib = jnp.dot(lhs, w1_ref[t], preferred_element_type=jnp.float32)
        if t == 0:
            acc_ref[...] = contrib
        else:
            acc_ref[...] += contrib

    y = acc_ref[...]
    y_ref[...] = y.reshape(1, oh, ow, cout_p).astype(y_ref.dtype)

    # bn2 batch-stat sums, accumulated across images (f32, before the bf16 store).
    ys_acc_ref[...] += jnp.concatenate(
        [jnp.sum(y, axis=0, keepdims=True),
         jnp.sum(y * y, axis=0, keepdims=True)], axis=0)

    @pl.when(n == pl.num_programs(0) - 1)
    def _finalize():
        ysums_ref[...] = ys_acc_ref[...]


# ---------------------------------------------------------------------------
# Kernel 3: fused bn2+relu prologue -> 3x3 stride-1 conv (9 tap matmuls),
# with the shortcut (relu -> bn_sc -> 1x1 stride-2 conv + bias) evaluated only
# at the stride-2 sampled pixels and folded into the accumulator init.
# Grid axis is "parallel" (no cross-step state: scratches fully rewritten).
# ---------------------------------------------------------------------------
def _conv2_kernel(y_ref, x00_ref, coef2_ref, coefsc_ref, w2_ref, wsc_ref, bsc_ref,
                  out_ref, bpad_ref, acc_ref):
    oh, ow = y_ref.shape[1], y_ref.shape[2]
    cin_p, cout_p = x00_ref.shape[-1], y_ref.shape[-1]

    # shortcut: bn_sc(relu(x)) at the (0,0)-parity pixels, 1x1 conv + bias -> init.
    s = jnp.maximum(x00_ref[0], 0.0) * coefsc_ref[0:1, :] + coefsc_ref[1:2, :]
    s = s.reshape(oh * ow, cin_p).astype(MM_DTYPE)
    acc_ref[...] = (jnp.dot(s, wsc_ref[...], preferred_element_type=jnp.float32)
                    + bsc_ref[...])

    # b = relu(bn2(y)) into a zero-padded scratch (re-zeroed each block: megacore-safe).
    bpad_ref[...] = jnp.zeros_like(bpad_ref)
    yb = y_ref[0].astype(jnp.float32)
    bpad_ref[1:oh + 1, 1:ow + 1, :] = jnp.maximum(
        yb * coef2_ref[0:1, :] + coef2_ref[1:2, :], 0.0)

    # 3x3 / stride-1 / pad-1 conv as 9 tap matmuls.
    for t, (kh, kw) in enumerate(_TAPS):
        lhs = bpad_ref[kh:kh + oh, kw:kw + ow, :]
        lhs = lhs.reshape(oh * ow, cout_p).astype(MM_DTYPE)
        acc_ref[...] += jnp.dot(lhs, w2_ref[t], preferred_element_type=jnp.float32)

    out_ref[...] = acc_ref[...].reshape(1, oh, ow, cout_p)


# ---------------------------------------------------------------------------
# Wrapper: layout plumbing only (NCHW <-> NHWC, lane padding, parity split,
# weight repacking, tiny per-channel coefficient math).
# ---------------------------------------------------------------------------
def resnet_block2_forward(x_nchw, params, stride=1):
    if stride != 1:
        # TODO(synk): the PyTorch module's residual add is only shape-consistent
        # for stride=1 (conv2 stride != 1 breaks main-vs-shortcut spatial sizes).
        raise NotImplementedError("resnet_block2 shortcut add requires stride=1")
    n, c, h, w = x_nchw.shape
    assert h % 2 == 0 and w % 2 == 0, "spatial dims must be even for the s2 conv"
    c2 = 2 * c
    cin_p = _round_up(c, LANE)
    cout_p = _round_up(c2, LANE)
    oh, ow = h // 2, w // 2
    f32 = jnp.float32

    # NCHW -> NHWC, lane-pad channels, spatial-parity split (row = n*4 + 2*ph + pw).
    x = jnp.transpose(x_nchw, (0, 2, 3, 1)).astype(f32)
    x = jnp.pad(x, ((0, 0), (0, 0), (0, 0), (0, cin_p - c)))
    xp = x.reshape(n, oh, 2, ow, 2, cin_p).transpose(0, 2, 4, 1, 3, 5)
    xp = xp.reshape(n * 4, oh, ow, cin_p)

    cpad = lambda v, tot: jnp.pad(v.astype(f32), (0, tot - v.shape[0]))
    g1, b1 = cpad(params["g1"], cin_p), cpad(params["b1"], cin_p)
    gsc, bsc = cpad(params["g_sc"], cin_p), cpad(params["b_sc"], cin_p)
    g2, b2 = cpad(params["g2"], cout_p), cpad(params["b2"], cout_p)

    def conv_w_taps(w_oihw, ci_p, co_p):
        # (O, I, 3, 3) -> (9 taps, ci_p, co_p), tap-major (kh, kw), bf16.
        o, i = w_oihw.shape[0], w_oihw.shape[1]
        wt = jnp.transpose(w_oihw.astype(f32), (2, 3, 1, 0)).reshape(9, i, o)
        wt = jnp.pad(wt, ((0, 0), (0, ci_p - i), (0, co_p - o)))
        return wt.astype(MM_DTYPE)

    w1s = conv_w_taps(params["w1"], cin_p, cout_p)
    w2s = conv_w_taps(params["w2"], cout_p, cout_p)
    wsc = jnp.pad(params["w_sc"][:, :, 0, 0].T.astype(f32),
                  ((0, cin_p - c), (0, cout_p - c2))).astype(MM_DTYPE)
    bias_sc = jnp.pad(params["bias_sc"].astype(f32),
                      (0, cout_p - c2)).reshape(1, cout_p)

    grid = (n,)
    xp_spec = pl.BlockSpec((4, oh, ow, cin_p), lambda i: (i, 0, 0, 0))

    # -- kernel 1: batch statistics of x and relu(x) ---------------------------
    sums = pl.pallas_call(
        _stats_kernel,
        out_shape=jax.ShapeDtypeStruct((4, cin_p), f32),
        grid=grid,
        in_specs=[xp_spec],
        out_specs=pl.BlockSpec((4, cin_p), lambda i: (0, 0)),
        scratch_shapes=[pltpu.VMEM((4, cin_p), f32)],
        compiler_params=pltpu.CompilerParams(
            dimension_semantics=("arbitrary",), vmem_limit_bytes=_VMEM_LIMIT),
    )(xp)

    m1 = float(n * h * w)
    mu1, msq1, mur, msqr = sums[0] / m1, sums[1] / m1, sums[2] / m1, sums[3] / m1
    scale1 = g1 * lax.rsqrt(jnp.maximum(msq1 - mu1 * mu1, 0.0) + EPS)
    shift1 = b1 - mu1 * scale1
    scale_sc = gsc * lax.rsqrt(jnp.maximum(msqr - mur * mur, 0.0) + EPS)
    shift_sc = bsc - mur * scale_sc
    coef1 = jnp.stack([scale1, shift1])            # (2, cin_p)
    coefsc = jnp.stack([scale_sc, shift_sc])       # (2, cin_p)

    # -- kernel 2: bn1+relu -> conv1 (3x3 s2) + bn2 stats ----------------------
    y, ysums = pl.pallas_call(
        _conv1_kernel,
        out_shape=(jax.ShapeDtypeStruct((n, oh, ow, cout_p), MM_DTYPE),
                   jax.ShapeDtypeStruct((2, cout_p), f32)),
        grid=grid,
        in_specs=[xp_spec,
                  pl.BlockSpec((2, cin_p), lambda i: (0, 0)),
                  pl.BlockSpec((9, cin_p, cout_p), lambda i: (0, 0, 0))],
        out_specs=(pl.BlockSpec((1, oh, ow, cout_p), lambda i: (i, 0, 0, 0)),
                   pl.BlockSpec((2, cout_p), lambda i: (0, 0))),
        scratch_shapes=[pltpu.VMEM((4, oh + 1, ow + 1, cin_p), f32),
                        pltpu.VMEM((oh * ow, cout_p), f32),
                        pltpu.VMEM((2, cout_p), f32)],
        compiler_params=pltpu.CompilerParams(
            dimension_semantics=("arbitrary",), vmem_limit_bytes=_VMEM_LIMIT),
    )(xp, coef1, w1s)

    m2 = float(n * oh * ow)
    mu2 = ysums[0] / m2
    scale2 = g2 * lax.rsqrt(jnp.maximum(ysums[1] / m2 - mu2 * mu2, 0.0) + EPS)
    shift2 = b2 - mu2 * scale2
    coef2 = jnp.stack([scale2, shift2])            # (2, cout_p)

    # -- kernel 3: bn2+relu -> conv2 (3x3 s1) + shortcut -----------------------
    out_p = pl.pallas_call(
        _conv2_kernel,
        out_shape=jax.ShapeDtypeStruct((n, oh, ow, cout_p), f32),
        grid=grid,
        in_specs=[pl.BlockSpec((1, oh, ow, cout_p), lambda i: (i, 0, 0, 0)),   # y
                  pl.BlockSpec((1, oh, ow, cin_p), lambda i: (4 * i, 0, 0, 0)),  # (0,0) parity of x
                  pl.BlockSpec((2, cout_p), lambda i: (0, 0)),
                  pl.BlockSpec((2, cin_p), lambda i: (0, 0)),
                  pl.BlockSpec((9, cout_p, cout_p), lambda i: (0, 0, 0)),
                  pl.BlockSpec((cin_p, cout_p), lambda i: (0, 0)),
                  pl.BlockSpec((1, cout_p), lambda i: (0, 0))],
        out_specs=pl.BlockSpec((1, oh, ow, cout_p), lambda i: (i, 0, 0, 0)),
        scratch_shapes=[pltpu.VMEM((oh + 2, ow + 2, cout_p), f32),
                        pltpu.VMEM((oh * ow, cout_p), f32)],
        compiler_params=pltpu.CompilerParams(
            dimension_semantics=("parallel",), vmem_limit_bytes=_VMEM_LIMIT),
    )(y, xp, coef2, coefsc, w2s, wsc, bias_sc)

    out = out_p[..., :c2]                          # drop channel padding
    return jnp.transpose(out, (0, 3, 1, 2))        # back to NCHW


# ---------------------------------------------------------------------------
# Pure-JAX f32 reference (for the in-script correctness check).
# ---------------------------------------------------------------------------
def resnet_block2_reference(x_nchw, params, stride=1):
    x = jnp.transpose(x_nchw, (0, 2, 3, 1)).astype(jnp.float32)

    def bn(t, g, b):
        mu = jnp.mean(t, axis=(0, 1, 2), keepdims=True)
        var = jnp.mean((t - mu) ** 2, axis=(0, 1, 2), keepdims=True)
        return ((t - mu) * lax.rsqrt(var + EPS) * g.reshape(1, 1, 1, -1)
                + b.reshape(1, 1, 1, -1))

    def conv(t, w_oihw, st, pad):
        w_hwio = jnp.transpose(w_oihw, (2, 3, 1, 0))
        return lax.conv_general_dilated(
            t, w_hwio, (st, st), [(pad, pad), (pad, pad)],
            dimension_numbers=("NHWC", "HWIO", "NHWC"))

    a = jax.nn.relu(bn(x, params["g1"], params["b1"]))
    y = conv(a, params["w1"], 2, 1)
    b = jax.nn.relu(bn(y, params["g2"], params["b2"]))
    out = conv(b, params["w2"], stride, 1)
    s = bn(jax.nn.relu(x), params["g_sc"], params["b_sc"])
    out = out + conv(s, params["w_sc"], 2, 0) + params["bias_sc"].reshape(1, 1, 1, -1)
    return jnp.transpose(out, (0, 3, 1, 2))


def init_params(key, channels):
    c, c2 = channels, 2 * channels
    ks = jax.random.split(key, 10)
    return {
        "g1": 1.0 + 0.1 * jax.random.normal(ks[0], (c,), jnp.float32),
        "b1": 0.1 * jax.random.normal(ks[1], (c,), jnp.float32),
        "w1": 0.1 * jax.random.normal(ks[2], (c2, c, 3, 3), jnp.float32),
        "g2": 1.0 + 0.1 * jax.random.normal(ks[3], (c2,), jnp.float32),
        "b2": 0.1 * jax.random.normal(ks[4], (c2,), jnp.float32),
        "w2": 0.1 * jax.random.normal(ks[5], (c2, c2, 3, 3), jnp.float32),
        "g_sc": 1.0 + 0.1 * jax.random.normal(ks[6], (c,), jnp.float32),
        "b_sc": 0.1 * jax.random.normal(ks[7], (c,), jnp.float32),
        "w_sc": 0.1 * jax.random.normal(ks[8], (c2, c, 1, 1), jnp.float32),
        "bias_sc": 0.1 * jax.random.normal(ks[9], (c2,), jnp.float32),
    }


if __name__ == "__main__":
    key = jax.random.PRNGKey(0)
    kx, kp = jax.random.split(key)
    n, c, h, w = 2, 4, 16, 16
    x = jax.random.normal(kx, (n, c, h, w), jnp.float32)
    params = init_params(kp, c)

    out = jax.block_until_ready(resnet_block2_forward(x, params, stride=1))
    ref = jax.block_until_ready(resnet_block2_reference(x, params, stride=1))

    assert out.shape == (n, 2 * c, h // 2, w // 2), out.shape
    # bf16 MXU operands (f32 accumulation) vs. an all-f32 reference.
    rel = float(jnp.linalg.norm(out - ref) / (jnp.linalg.norm(ref) + 1e-12))
    max_abs = float(jnp.max(jnp.abs(out - ref)))
    assert rel < 2e-2 and max_abs < 1e-1, (rel, max_abs)
    print("KERNEL_OK")
</pallas_src>

<mosaic_0001>
module attributes {stable_mosaic.version = 11 : i64} {
  func.func @_stats_kernel(%arg0: i32, %arg1: memref<4x8x8x128xf32, #tpu.memory_space<vmem>>, %arg2: memref<4x128xf32, #tpu.memory_space<vmem>>, %arg3: memref<4x128xf32, #tpu.memory_space<vmem>>) attributes {dimension_semantics = [#tpu.dimension_semantics<arbitrary>], iteration_bounds = array<i64: 2>, scalar_prefetch = 0 : i64, scratch_operands = 1 : i64, tpu.core_type = #tpu.core_type<tc>, window_params = [{transform_indices = @transform_0, window_bounds = array<i64: 4, 8, 8, 128>}, {pipeline_mode = #tpu.pipeline_mode<synchronous>, transform_indices = @transform_1, window_bounds = array<i64: 4, 128>}]} {
    %c0 = arith.constant 0 : index
    %c0_0 = arith.constant 0 : index
    %c0_1 = arith.constant 0 : index
    %c0_2 = arith.constant 0 : index
    %0 = vector.load %arg1[%c0, %c0_0, %c0_1, %c0_2] : memref<4x8x8x128xf32, #tpu.memory_space<vmem>>, vector<4x8x8x128xf32>
    %1 = vector.shape_cast %0 : vector<4x8x8x128xf32> to vector<256x128xf32>
    %cst = arith.constant 0.000000e+00 : f32
    %2 = vector.broadcast %cst : f32 to vector<256x128xf32>
    %3 = arith.maximumf %1, %2 : vector<256x128xf32>
    %c0_i32 = arith.constant 0 : i32
    %4 = arith.cmpi eq, %arg0, %c0_i32 : i32
    %5 = arith.extui %4 : i1 to i32
    %c0_i32_3 = arith.constant 0 : i32
    %6 = arith.cmpi ne, %5, %c0_i32_3 : i32
    scf.if %6 {
      %cst_13 = arith.constant 0.000000e+00 : f32
      %24 = vector.broadcast %cst_13 : f32 to vector<4x128xf32>
      %c0_14 = arith.constant 0 : index
      %c0_15 = arith.constant 0 : index
      %25 = vector.load %arg3[%c0_14, %c0_15] : memref<4x128xf32, #tpu.memory_space<vmem>>, vector<4x128xf32>
      tpu.vector_store %arg3[%c0_14, %c0_15], %24 {strides = array<i32>} : memref<4x128xf32, #tpu.memory_space<vmem>>, vector<4x128xf32>,
    } else {
    }
    %c0_4 = arith.constant 0 : index
    %c0_5 = arith.constant 0 : index
    %7 = vector.load %arg3[%c0_4, %c0_5] : memref<4x128xf32, #tpu.memory_space<vmem>>, vector<4x128xf32>
    %cst_6 = arith.constant dense<0.000000e+00> : vector<128xf32>
    %8 = vector.multi_reduction <add>, %1, %cst_6 [0] : vector<256x128xf32> to vector<128xf32>
    %9 = vector.shape_cast %8 : vector<128xf32> to vector<1x128xf32>
    %10 = arith.mulf %1, %1 : vector<256x128xf32>
    %cst_7 = arith.constant dense<0.000000e+00> : vector<128xf32>
    %11 = vector.multi_reduction <add>, %10, %cst_7 [0] : vector<256x128xf32> to vector<128xf32>
    %12 = vector.shape_cast %11 : vector<128xf32> to vector<1x128xf32>
    %cst_8 = arith.constant dense<0.000000e+00> : vector<128xf32>
    %13 = vector.multi_reduction <add>, %3, %cst_8 [0] : vector<256x128xf32> to vector<128xf32>
    %14 = vector.shape_cast %13 : vector<128xf32> to vector<1x128xf32>
    %15 = arith.mulf %3, %3 : vector<256x128xf32>
    %cst_9 = arith.constant dense<0.000000e+00> : vector<128xf32>
    %16 = vector.multi_reduction <add>, %15, %cst_9 [0] : vector<256x128xf32> to vector<128xf32>
    %17 = vector.shape_cast %16 : vector<128xf32> to vector<1x128xf32>
    %18 = tpu.concatenate %9, %12, %14, %17 in 0 : vector<1x128xf32>, vector<1x128xf32>, vector<1x128xf32>, vector<1x128xf32> -> vector<4x128xf32>
    %19 = arith.addf %7, %18 : vector<4x128xf32>
    %c0_10 = arith.constant 0 : index
    %c0_11 = arith.constant 0 : index
    %20 = vector.load %arg3[%c0_10, %c0_11] : memref<4x128xf32, #tpu.memory_space<vmem>>, vector<4x128xf32>
    tpu.vector_store %arg3[%c0_10, %c0_11], %19 {strides = array<i32>} : memref<4x128xf32, #tpu.memory_space<vmem>>, vector<4x128xf32>,
    %c1_i32 = arith.constant 1 : i32
    %21 = arith.cmpi eq, %arg0, %c1_i32 : i32
    %22 = arith.extui %21 : i1 to i32
    %c0_i32_12 = arith.constant 0 : i32
    %23 = arith.cmpi ne, %22, %c0_i32_12 : i32
    scf.if %23 {
      %c0_13 = arith.constant 0 : index
      %c0_14 = arith.constant 0 : index
      %24 = vector.load %arg3[%c0_13, %c0_14] : memref<4x128xf32, #tpu.memory_space<vmem>>, vector<4x128xf32>
      %c0_15 = arith.constant 0 : index
      %c0_16 = arith.constant 0 : index
      %25 = vector.load %arg2[%c0_15, %c0_16] : memref<4x128xf32, #tpu.memory_space<vmem>>, vector<4x128xf32>
      tpu.vector_store %arg2[%c0_15, %c0_16], %24 {strides = array<i32>} : memref<4x128xf32, #tpu.memory_space<vmem>>, vector<4x128xf32>,
    } else {
    }
    return
  }
  func.func @transform_0(%arg0: i32) -> (i32, i32, i32, i32) {
    %c0_i32 = arith.constant 0 : i32
    %c0_i32_0 = arith.constant 0 : i32
    %c0_i32_1 = arith.constant 0 : i32
    %c0_i32_2 = arith.constant 0 : i32
    return %arg0, %c0_i32, %c0_i32_0, %c0_i32_1 : i32, i32, i32, i32
  }
  func.func @transform_1(%arg0: i32) -> (i32, i32) {
    %c0_i32 = arith.constant 0 : i32
    %c0_i32_0 = arith.constant 0 : i32
    %c0_i32_1 = arith.constant 0 : i32
    return %c0_i32, %c0_i32_0 : i32, i32
  }
}

</mosaic_0001>

<bundles_post_ra>
// kernel: tpu_custom_call.1
= control target key start
LH: loop header
LB: loop body
LE: loop exit
PB: predicated region body
PF: predicated region fallthrough
CT: control target
= control target key end

     0   :  { %6 = vsyncpa [#allocation4], 0  ;;  %s1139_s0 = inlined_call_operand.hbm [shape: f32[8,8,8,128], index: 0, kind: input, shape index: {}]   ;;  %s1140_s1 = inlined_call_operand.hbm [shape: f32[4,128], index: 1, kind: output, shape index: {}]  }
   0x1   :  { %8 = vsyncpa [#allocation4 + $0x1], 0 }
   0x2   :  { %9 = vsyncpa [#allocation5], 0  ;;  %s660_s6 = smov 0   ;;  %s662_s7 = smov 0  }
   0x3   :  { %s664_s8 = smov 0   ;;  %s666_s9 = smov 0  }
   0x4 LB: > { %s679_s10 = sadd.s32 4294967295, %s644_s9   ;;  %s682_s11 = sadd.s32 1, %s644_s9   ;;  %s644_s9 = sphi %s666_s9, %s1187_s9   ;;  %s640_s8 = sphi %s664_s8, %s1186_s8   ;;  %s636_s7 = sphi %s662_s7, %s1185_s7   ;;  %s632_s6 = sphi %s660_s6, %s1184_s6  }
   0x5   : > { %s19_s12 = ssub.s32 %s644_s9, %s682_s11  ;;  %s22_s13 = sadd.s32 1, %s640_s8 }
   0x6   : > { %p20_p0 = scmp.eq.s32.totalorder %s19_s12, 0  ;;  %p29_p1 = scmp.ne.s32.totalorder %s640_s8, %s636_s7 }
   0x7   : > { %p30_p2 = scmp.eq.s32.totalorder %s644_s9, 0  ;;  %p35_p3 = scmp.ne.s32.totalorder %s636_s7, %s632_s6 }
   0x8   : > { %s692_s14 = scalar_select %p20_p0, %s640_s8, %s22_s13  }
   0x9   : > { %p694_p4 = por %p30_p2, %p29_p1  ;;  %p36_p5 = scmp.eq.s32.totalorder %s679_s10, 0 }
   0xa   : > { %p509_p6 = scmp.lt.s32.totalorder %s644_s9, 2  ;;  %s80_s17 = sand.u32 1, %s640_s8  }
   0xb   : > { %p700_p7 = por %p36_p5, %p35_p3  ;;  %s485_s18 = sshll.u32 %s80_s17, 8 }
   0xc   : > { %s498_s19 = sshll.u32 %s644_s9, 8  ;;  %s84_s23 = scalar_lea.vmem [#allocation3], %s485_s18 }
   0xd   : > { %s90_s22 = scalar_lea.hbm %s1139_s0, %s498_s19  ;;  %s93_s24 = sshll.u32 %s84_s23, 4  ;;  %s94_s24 = int_to_ptr.vmem [resolvable:$true] %s93_s24 }
   0xe   : > { %s91_s25 = sshll.u32 %s90_s22, 4  ;;  %p711_p8 = pnand %p509_p6, %p694_p4  ;;  %s92_s25 = int_to_ptr.hbm [resolvable:$true] %s91_s25 }
   0xf   : > { %p489_p9 = scmp.ge.s32.totalorder %s644_s9, 1  ;;  %s81_s27 = scalar_lea.sflag [#allocation4], %s80_s17 }
  0x10   : > { %s548_s28 = sshra.s32 %s92_s25, 4  ;;  %p552_p11 = pneg %p711_p8  ;;  %s549_s28 = int_to_ptr.hbm [resolvable:$true] %s548_s28 }
  0x11   : > { %s550_s29 = scalar_lea.hbm %s549_s28, 256  ;;  %s555_s3 = scalar_lea.hbm %s1139_s0, 512 }
  0x12   : > { %p551_p10 = scmp.ne.s32.totalorder %s549_s28, %s550_s29  ;;  %p556_p0 = scmp.lt.s32.totalorder %s549_s28, %s1139_s0 }
  0x13   : > { %p557_p1 = scmp.lt.s32.totalorder %s555_s3, %s550_s29 }
  0x14   : > { %p553_p12 = pnand %p552_p11, %p551_p10 }
  0x15   : > { %p558_p2 = por %p557_p1, %p556_p0 }
  0x16   : > { %p554_p13 = pneg %p553_p12 }
  0x18   : > { %p559_p3 = pnand %p558_p2, %p554_p13 }
  0x1a   : > { %562 = shalt.err (!%p559_p3)
}
  0x1b   : > { %s646_s6 = smov 128   ;;  %s647_s12 = smov 8  }
  0x1c   : > { %508 = dma.hbm_to_vmem [thread:$0]  (!%p711_p8), %s92_s25, 4096, %s94_s24, %s81_s27, %s646_s6, %s646_s6, %s647_s12  }
  0x1d   : > { %p101_p4 = scmp.lt.s32.totalorder %s644_s9, 3 }
  0x1f   : > { %p102_p5 = pnand %p489_p9, %p101_p4 }
  0x21   : > { %105 = sbr.rel (%p102_p5) target bundleno = 171 (0xab), region = 24 }
  0x26   : > { %s107_s13 = sand.u32 1, %s636_s7  }
  0x27   : > { %s490_s15 = sshll.u32 %s107_s13, 8  ;;  %s108_s17 = scalar_lea.sflag [#allocation4], %s107_s13 }
  0x28   : > { %s730_s18 = scalar_lea.vmem [#allocation3], %s490_s15 }
  0x29   : > { %623 = dma.done.wait (%p700_p7), %s108_s17, 4096  }
  0x2a   : > { %625 = vsyncadd (%p700_p7), %s108_s17, 4294963200  ;;  %v737_v0 = vld [vmem:[%s730_s18] sm:$0xff]  ;;  %v740_v1 = vld [vmem:[%s730_s18 + $0x8] sm:$0xff]  ;;  %p491_p6 = scmp.ne.s32.totalorder %s679_s10, 0 }
  0x2b   : > { %v743_v2 = vld [vmem:[%s730_s18 + $0x10] sm:$0xff]  ;;  %v746_v3 = vld [vmem:[%s730_s18 + $0x18] sm:$0xff]  ;;  %v749_v4 = vld [vmem:[%s730_s18 + $0x20] sm:$0xff]  ;;  %v755_v6 = vmax.f32 %v737_v0, 0.0  ;;  %v758_v7 = vmax.f32 %v740_v1, 0.0 }
  0x2c   : > { %v752_v5 = vld [vmem:[%s730_s18 + $0x28] sm:$0xff]  ;;  %v761_v8 = vmax.f32 %v743_v2, 0.0  ;;  %v764_v9 = vld [vmem:[%s730_s18 + $0x30] sm:$0xff]  ;;  %v767_v10 = vld [vmem:[%s730_s18 + $0x38] sm:$0xff]  ;;  %v773_v12 = vmax.f32 %v746_v3, 0.0  ;;  %v776_v13 = vmax.f32 %v749_v4, 0.0 }
  0x2d   : > { %v770_v11 = vld [vmem:[%s730_s18 + $0x40] sm:$0xff]  ;;  %v779_v14 = vmax.f32 %v752_v5, 0.0  ;;  %v782_v15 = vld [vmem:[%s730_s18 + $0x48] sm:$0xff]  ;;  %v785_v16 = vld [vmem:[%s730_s18 + $0x50] sm:$0xff]  ;;  %v791_v18 = vmax.f32 %v764_v9, 0.0  ;;  %v794_v19 = vmax.f32 %v767_v10, 0.0 }
  0x2e   : > { %v788_v17 = vld [vmem:[%s730_s18 + $0x58] sm:$0xff]  ;;  %v797_v20 = vmax.f32 %v770_v11, 0.0  ;;  %v800_v21 = vld [vmem:[%s730_s18 + $0x60] sm:$0xff]  ;;  %v803_v22 = vld [vmem:[%s730_s18 + $0x68] sm:$0xff]  ;;  %v809_v24 = vmax.f32 %v782_v15, 0.0  ;;  %v812_v25 = vmax.f32 %v785_v16, 0.0 }
  0x2f   : > { %v806_v23 = vld [vmem:[%s730_s18 + $0x70] sm:$0xff]  ;;  %v815_v26 = vmax.f32 %v788_v17, 0.0  ;;  %v818_v27 = vld [vmem:[%s730_s18 + $0x78] sm:$0xff]  ;;  %v821_v28 = vld [vmem:[%s730_s18 + $0x80] sm:$0xff]  ;;  %v827_v30 = vmax.f32 %v800_v21, 0.0  ;;  %v830_v31 = vmax.f32 %v803_v22, 0.0 }
  0x30   : > { %v824_v29 = vld [vmem:[%s730_s18 + $0x88] sm:$0xff]  ;;  %v833_v32 = vmax.f32 %v806_v23, 0.0  ;;  %v836_v33 = vld [vmem:[%s730_s18 + $0x90] sm:$0xff]  ;;  %v839_v34 = vld [vmem:[%s730_s18 + $0x98] sm:$0xff]  ;;  %v845_v36 = vmax.f32 %v818_v27, 0.0  ;;  %v848_v37 = vmax.f32 %v821_v28, 0.0 }
  0x31   : > { %v842_v35 = vld [vmem:[%s730_s18 + $0xa0] sm:$0xff]  ;;  %v851_v38 = vmax.f32 %v824_v29, 0.0  ;;  %v854_v39 = vld [vmem:[%s730_s18 + $0xa8] sm:$0xff]  ;;  %v857_v40 = vld [vmem:[%s730_s18 + $0xb0] sm:$0xff]  ;;  %v863_v42 = vmax.f32 %v836_v33, 0.0  ;;  %v866_v43 = vmax.f32 %v839_v34, 0.0 }
  0x32   : > { %v860_v41 = vld [vmem:[%s730_s18 + $0xb8] sm:$0xff]  ;;  %v869_v44 = vmax.f32 %v842_v35, 0.0  ;;  %v872_v45 = vld [vmem:[%s730_s18 + $0xc0] sm:$0xff]  ;;  %v875_v46 = vld [vmem:[%s730_s18 + $0xc8] sm:$0xff]  ;;  %v881_v48 = vmax.f32 %v854_v39, 0.0  ;;  %v884_v49 = vmax.f32 %v857_v40, 0.0 }
  0x33   : > { %v878_v47 = vld [vmem:[%s730_s18 + $0xd0] sm:$0xff]  ;;  %v887_v50 = vmax.f32 %v860_v41, 0.0  ;;  %v890_v51 = vld [vmem:[%s730_s18 + $0xd8] sm:$0xff]  ;;  %v893_v52 = vld [vmem:[%s730_s18 + $0xe0] sm:$0xff]  ;;  %v899_v54 = vmax.f32 %v872_v45, 0.0  ;;  %v902_v55 = vmax.f32 %v875_v46, 0.0 }
  0x34   : > { %1160 = vst [vmem:[#allocation9_spill] sm:$0xff] %v893_v52  ;;  %v896_v53 = vld [vmem:[%s730_s18 + $0xe8] sm:$0xff]  ;;  %v905_v56 = vmax.f32 %v878_v47, 0.0  ;;  %v908_v57 = vld [vmem:[%s730_s18 + $0xf0] sm:$0xff]  ;;  %v911_v58 = vld [vmem:[%s730_s18 + $0xf8] sm:$0xff]  ;;  %v914_v59 = vmax.f32 %v890_v51, 0.0 }
  0x35   : > { %1161 = vst [vmem:[#allocation10_spill] sm:$0xff] %v896_v53  ;;  %v917_v60 = vmax.f32 %v893_v52, 0.0  ;;  %v920_v61 = vmax.f32 %v896_v53, 0.0  ;;  %v923_v62 = vmax.f32 %v908_v57, 0.0  ;;  %v926_v63 = vmax.f32 %v911_v58, 0.0 }
  0x36   : > { %1162 = vst [vmem:[#allocation11_spill] sm:$0xff] %v899_v54 }
  0x37   : > { %1163 = vst [vmem:[#allocation12_spill] sm:$0xff] %v902_v55 }
  0x38   : > { %1164 = vst [vmem:[#allocation13_spill] sm:$0xff] %v905_v56 }
  0x39   : > { %1165 = vst [vmem:[#allocation14_spill] sm:$0xff] %v908_v57 }
  0x3a   : > { %1166 = vst [vmem:[#allocation15_spill] sm:$0xff] %v911_v58 }
  0x3b   : > { %1167 = vst [vmem:[#allocation16_spill] sm:$0xff] %v914_v59  ;;  %194 = sbr.rel (%p491_p6) target bundleno = 66 (0x42), region = 32 }
  0x3c   : > { %1168 = vst [vmem:[#allocation17_spill] sm:$0xff] %v917_v60 }
  0x3d   : > { %1169 = vst [vmem:[#allocation18_spill] sm:$0xff] %v920_v61 }
  0x3e   : > { %1170 = vst [vmem:[#allocation19_spill] sm:$0xff] %v923_v62 }
  0x3f   : > { %1171 = vst [vmem:[#allocation20_spill] sm:$0xff] %v926_v63 }
  0x40   : > { %v648_v56 = vmov 0.0  }
  0x41   : > { %195 = vst [vmem:[#allocation2] sm:$0xf] %v648_v56 }
  0x42 PF: > { %v197_v59 = vadd.f32 %v740_v1, %v737_v0  ;;  %v234_v60 = vmul.f32 %v737_v0, %v737_v0  ;;  %v235_v61 = vmul.f32 %v740_v1, %v740_v1  ;;  %v236_v63 = vmul.f32 %v743_v2, %v743_v2  ;;  %p492_p7 = scmp.ne.s32.totalorder %s679_s10, 1 }
  0x43   : > { %v237_v56 = vmul.f32 %v746_v3, %v746_v3  ;;  %v303_v55 = vadd.f32 %v758_v7, %v755_v6  ;;  %v238_v0 = vmul.f32 %v749_v4, %v749_v4  ;;  %vm409_vm0 = vcmask 1040384  }
  0x44   : > { %v198_v62 = vadd.f32 %v197_v59, %v743_v2  ;;  %v266_v57 = vadd.f32 %v235_v61, %v234_v60  ;;  %v239_v2 = vmul.f32 %v752_v5, %v752_v5  ;;  %vm411_vm1 = vcmask 1041408  }
  0x45   : > { %v304_v52 = vadd.f32 %v303_v55, %v761_v8  ;;  %vm413_vm2 = vcmask 1042432  }
  0x46   : > { %v199_v58 = vadd.f32 %v198_v62, %v746_v3  ;;  %v267_v1 = vadd.f32 %v266_v57, %v236_v63  ;;  %v341_v57 = vmul.f32 %v758_v7, %v758_v7  ;;  %v343_v7 = vmul.f32 %v773_v12, %v773_v12 }
  0x47   : > { %v305_v60 = vadd.f32 %v304_v52, %v773_v12  ;;  %v245_v12 = vmul.f32 %v788_v17, %v788_v17 }
  0x48   : > { %v200_v53 = vadd.f32 %v199_v58, %v749_v4  ;;  %v268_v62 = vadd.f32 %v267_v1, %v237_v56  ;;  %v240_v58 = vmul.f32 %v764_v9, %v764_v9 }
  0x49   : > { %v306_v4 = vadd.f32 %v305_v60, %v776_v13 }
  0x4a   : > { %v201_v59 = vadd.f32 %v200_v53, %v752_v5  ;;  %v269_v61 = vadd.f32 %v268_v62, %v238_v0  ;;  %v241_v53 = vmul.f32 %v767_v10, %v767_v10  ;;  %v340_v5 = vmul.f32 %v755_v6, %v755_v6 }
  0x4b   : > { %v307_v63 = vadd.f32 %v306_v4, %v779_v14  ;;  %v342_v0 = vmul.f32 %v761_v8, %v761_v8  ;;  %v243_v6 = vmul.f32 %v782_v15, %v782_v15  ;;  %v244_v62 = vmul.f32 %v785_v16, %v785_v16 }
  0x4c   : > { %v202_v3 = vadd.f32 %v201_v59, %v764_v9  ;;  %v270_v55 = vadd.f32 %v269_v61, %v239_v2  ;;  %v242_v9 = vmul.f32 %v770_v11, %v770_v11  ;;  %v345_v4 = vmul.f32 %v779_v14, %v779_v14 }
  0x4d   : > { %v308_v1 = vadd.f32 %v307_v63, %v791_v18  ;;  %v247_v14 = vmul.f32 %v803_v22, %v803_v22 }
  0x4e   : > { %v203_v54 = vadd.f32 %v202_v3, %v767_v10  ;;  %v271_v56 = vadd.f32 %v270_v55, %v240_v58  ;;  %v344_v3 = vmul.f32 %v776_v13, %v776_v13  ;;  %v246_v13 = vmul.f32 %v800_v21, %v800_v21 }
  0x50   : > { %v204_v52 = vadd.f32 %v203_v54, %v770_v11  ;;  %v272_v59 = vadd.f32 %v271_v56, %v241_v53  ;;  %v372_v54 = vadd.f32 %v341_v57, %v340_v5  ;;  %v309_v11 = vadd.f32 %v308_v1, %v794_v19 }
  0x51   : > { %v346_v57 = vmul.f32 %v791_v18, %v791_v18  ;;  %v347_v56 = vmul.f32 %v794_v19, %v794_v19  ;;  %v248_v18 = vmul.f32 %v806_v23, %v806_v23  ;;  %v249_v19 = vmul.f32 %v818_v27, %v818_v27 }
  0x52   : > { %v205_v10 = vadd.f32 %v204_v52, %v782_v15  ;;  %v273_v8 = vadd.f32 %v272_v59, %v242_v9  ;;  %v373_v60 = vadd.f32 %v372_v54, %v342_v0  ;;  %v310_v15 = vadd.f32 %v309_v11, %v797_v20 }
  0x54   : > { %v206_v2 = vadd.f32 %v205_v10, %v785_v16  ;;  %v274_v61 = vadd.f32 %v273_v8, %v243_v6  ;;  %v374_v53 = vadd.f32 %v373_v60, %v343_v7  ;;  %v311_v16 = vadd.f32 %v310_v15, %v809_v24 }
  0x55   : > { %v348_v6 = vmul.f32 %v797_v20, %v797_v20  ;;  %v250_v20 = vmul.f32 %v821_v28, %v821_v28 }
  0x56   : > { %v207_v58 = vadd.f32 %v206_v2, %v788_v17  ;;  %v275_v5 = vadd.f32 %v274_v61, %v244_v62  ;;  %v375_v52 = vadd.f32 %v374_v53, %v344_v3  ;;  %v312_v17 = vadd.f32 %v311_v16, %v812_v25 }
  0x57   : > { %v349_v2 = vmul.f32 %v809_v24, %v809_v24  ;;  %v350_v3 = vmul.f32 %v812_v25, %v812_v25  ;;  %v251_v24 = vmul.f32 %v824_v29, %v824_v29  ;;  %v252_v25 = vmul.f32 %v836_v33, %v836_v33 }
  0x58   : > { %v208_v55 = vadd.f32 %v207_v58, %v800_v21  ;;  %v276_v9 = vadd.f32 %v275_v5, %v245_v12  ;;  %v376_v0 = vadd.f32 %v375_v52, %v345_v4  ;;  %v313_v21 = vadd.f32 %v312_v17, %v815_v26 }
  0x59   : > { %v351_v12 = vmul.f32 %v815_v26, %v815_v26  ;;  %v253_v26 = vmul.f32 %v839_v34, %v839_v34 }
  0x5a   : > { %v209_v63 = vadd.f32 %v208_v55, %v803_v22  ;;  %v277_v1 = vadd.f32 %v276_v9, %v246_v13  ;;  %v377_v59 = vadd.f32 %v376_v0, %v346_v57  ;;  %v314_v22 = vadd.f32 %v313_v21, %v827_v30 }
  0x5b   : > { %v352_v55 = vmul.f32 %v827_v30, %v827_v30  ;;  %v353_v57 = vmul.f32 %v830_v31, %v830_v31  ;;  %v254_v30 = vmul.f32 %v842_v35, %v842_v35 }
  0x5c   : > { %v210_v10 = vadd.f32 %v209_v63, %v806_v23  ;;  %v278_v54 = vadd.f32 %v277_v1, %v247_v14  ;;  %v378_v11 = vadd.f32 %v377_v59, %v347_v56  ;;  %v315_v23 = vadd.f32 %v314_v22, %v830_v31 }
  0x5d   : > { %v354_v14 = vmul.f32 %v833_v32, %v833_v32  ;;  %v255_v31 = vmul.f32 %v854_v39, %v854_v39 }
  0x5e   : > { %v211_v7 = vadd.f32 %v210_v10, %v818_v27  ;;  %v279_v8 = vadd.f32 %v278_v54, %v248_v18  ;;  %v379_v60 = vadd.f32 %v378_v11, %v348_v6  ;;  %v316_v27 = vadd.f32 %v315_v23, %v833_v32 }
  0x5f   : > { %v355_v10 = vmul.f32 %v845_v36, %v845_v36  ;;  %v256_v32 = vmul.f32 %v857_v40, %v857_v40  ;;  %v356_v6 = vmul.f32 %v848_v37, %v848_v37 }
  0x60   : > { %v212_v62 = vadd.f32 %v211_v7, %v821_v28  ;;  %v280_v15 = vadd.f32 %v279_v8, %v249_v19  ;;  %v380_v61 = vadd.f32 %v379_v60, %v349_v2  ;;  %v317_v28 = vadd.f32 %v316_v27, %v845_v36 }
  0x61   : > { %v257_v36 = vmul.f32 %v860_v41, %v860_v41  ;;  %v357_v19 = vmul.f32 %v851_v38, %v851_v38 }
  0x62   : > { %v213_v58 = vadd.f32 %v212_v62, %v824_v29  ;;  %v281_v53 = vadd.f32 %v280_v15, %v250_v20  ;;  %v381_v16 = vadd.f32 %v380_v61, %v350_v3  ;;  %v318_v29 = vadd.f32 %v317_v28, %v848_v37 }
  0x63   : > { %v258_v37 = vmul.f32 %v872_v45, %v872_v45  ;;  %v358_v62 = vmul.f32 %v863_v42, %v863_v42  ;;  %v359_v3 = vmul.f32 %v866_v43, %v866_v43  ;;  %v361_v28 = vmul.f32 %v881_v48, %v881_v48 }
  0x64   : > { %v214_v4 = vadd.f32 %v213_v58, %v836_v33  ;;  %v282_v5 = vadd.f32 %v281_v53, %v251_v24  ;;  %v382_v52 = vadd.f32 %v381_v16, %v351_v12  ;;  %v319_v33 = vadd.f32 %v318_v29, %v851_v38  ;;  %v1173_v53 = vld [vmem:[#allocation9_spill] sm:$0xff] }
  0x65   : > { %v259_v38 = vmul.f32 %v875_v46, %v875_v46  ;;  %v360_v24 = vmul.f32 %v869_v44, %v869_v44  ;;  %v362_v29 = vmul.f32 %v884_v49, %v884_v49 }
  0x66   : > { %v215_v13 = vadd.f32 %v214_v4, %v839_v34  ;;  %v283_v17 = vadd.f32 %v282_v5, %v252_v25  ;;  %v383_v9 = vadd.f32 %v382_v52, %v352_v55  ;;  %v320_v34 = vadd.f32 %v319_v33, %v863_v42  ;;  %v1175_v5 = vld [vmem:[#allocation10_spill] sm:$0xff] }
  0x67   : > { %v260_v42 = vmul.f32 %v878_v47, %v878_v47  ;;  %v363_v33 = vmul.f32 %v887_v50, %v887_v50 }
  0x68   : > { %v216_v63 = vadd.f32 %v215_v13, %v842_v35  ;;  %v284_v0 = vadd.f32 %v283_v17, %v253_v26  ;;  %v384_v21 = vadd.f32 %v383_v9, %v353_v57  ;;  %v321_v35 = vadd.f32 %v320_v34, %v866_v43  ;;  %v1177_v17 = vld [vmem:[#allocation14_spill] sm:$0xff]  ;;  %v1178_v9 = vld [vmem:[#allocation16_spill] sm:$0xff] }
  0x69   : > { %v261_v43 = vmul.f32 %v890_v51, %v890_v51 }
  0x6a   : > { %v217_v56 = vadd.f32 %v216_v63, %v854_v39  ;;  %v285_v1 = vadd.f32 %v284_v0, %v254_v30  ;;  %v385_v59 = vadd.f32 %v384_v21, %v354_v14  ;;  %v322_v39 = vadd.f32 %v321_v35, %v869_v44 }
  0x6b   : > { %v262_v44 = vmul.f32 %v1173_v53, %v1173_v53 }
  0x6c   : > { %v218_v18 = vadd.f32 %v217_v56, %v857_v40  ;;  %v286_v22 = vadd.f32 %v285_v1, %v255_v31  ;;  %v386_v54 = vadd.f32 %v385_v59, %v355_v10  ;;  %v323_v40 = vadd.f32 %v322_v39, %v881_v48  ;;  %v1179_v10 = vld [vmem:[#allocation15_spill] sm:$0xff] }
  0x6d   : > { %v263_v48 = vmul.f32 %v1175_v5, %v1175_v5 }
  0x6e   : > { %v219_v7 = vadd.f32 %v218_v18, %v860_v41  ;;  %v287_v11 = vadd.f32 %v286_v22, %v256_v32  ;;  %v387_v23 = vadd.f32 %v386_v54, %v356_v6  ;;  %v324_v41 = vadd.f32 %v323_v40, %v884_v49  ;;  %v1180_v18 = vld [vmem:[#allocation17_spill] sm:$0xff]  ;;  %v1182_v54 = vld [vmem:[#allocation19_spill] sm:$0xff] }
  0x6f   : > { %v264_v49 = vmul.f32 %v1177_v17, %v1177_v17 }
  0x70   : > { %v220_v2 = vadd.f32 %v219_v7, %v872_v45  ;;  %v288_v8 = vadd.f32 %v287_v11, %v257_v36  ;;  %v388_v60 = vadd.f32 %v387_v23, %v357_v19  ;;  %v325_v45 = vadd.f32 %v324_v41, %v887_v50  ;;  %v1181_v7 = vld [vmem:[#allocation18_spill] sm:$0xff]  ;;  %v1183_v23 = vld [vmem:[#allocation20_spill] sm:$0xff] }
  0x71   : > { %v265_v50 = vmul.f32 %v1179_v10, %v1179_v10  ;;  %v367_v11 = vmul.f32 %v1178_v9, %v1178_v9 }
  0x72   : > { %v221_v20 = vadd.f32 %v220_v2, %v875_v46  ;;  %v289_v27 = vadd.f32 %v288_v8, %v258_v37  ;;  %v389_v15 = vadd.f32 %v388_v60, %v358_v62  ;;  %v1172_v46 = vld [vmem:[#allocation11_spill] sm:$0xff] }
  0x73   : > { %v326_v61 = vadd.f32 %v325_v45, %v1172_v46  ;;  %v364_v31 = vmul.f32 %v1172_v46, %v1172_v46  ;;  %v369_v45 = vmul.f32 %v1181_v7, %v1181_v7 }
  0x74   : > { %v222_v58 = vadd.f32 %v221_v20, %v878_v47  ;;  %v290_v4 = vadd.f32 %v289_v27, %v259_v38  ;;  %v390_v25 = vadd.f32 %v389_v15, %v359_v3  ;;  %v1174_v47 = vld [vmem:[#allocation12_spill] sm:$0xff]  ;;  %v368_v38 = vmul.f32 %v1180_v18, %v1180_v18 }
  0x75   : > { %v327_v16 = vadd.f32 %v326_v61, %v1174_v47  ;;  %v365_v1 = vmul.f32 %v1174_v47, %v1174_v47  ;;  %v370_v15 = vmul.f32 %v1182_v54, %v1182_v54 }
  0x76   : > { %v223_v12 = vadd.f32 %v222_v58, %v890_v51  ;;  %v291_v13 = vadd.f32 %v290_v4, %v260_v42  ;;  %v391_v26 = vadd.f32 %v390_v25, %v360_v24  ;;  %v1176_v51 = vld [vmem:[#allocation13_spill] sm:$0xff]  ;;  %v371_v4 = vmul.f32 %v1183_v23, %v1183_v23 }
  0x77   : > { %v328_v52 = vadd.f32 %v327_v16, %v1176_v51  ;;  %v366_v22 = vmul.f32 %v1176_v51, %v1176_v51 }
  0x78   : > { %v224_v55 = vadd.f32 %v223_v12, %v1173_v53  ;;  %v292_v63 = vadd.f32 %v291_v13, %v261_v43  ;;  %v392_v30 = vadd.f32 %v391_v26, %v361_v28 }
  0x79   : > { %v329_v56 = vadd.f32 %v328_v52, %v1178_v9 }
  0x7a   : > { %v225_v57 = vadd.f32 %v224_v55, %v1175_v5  ;;  %v293_v34 = vadd.f32 %v292_v63, %v262_v44  ;;  %v393_v0 = vadd.f32 %v392_v30, %v362_v29  ;;  %v196_v30 = vld [vmem:[#allocation2] sm:$0xf] }
  0x7b   : > { %v330_v35 = vadd.f32 %v329_v56, %v1180_v18 }
  0x7c   : > { %v226_v14 = vadd.f32 %v225_v57, %v1177_v17  ;;  %v294_v32 = vadd.f32 %v293_v34, %v263_v48  ;;  %v394_v6 = vadd.f32 %v393_v0, %v363_v33 }
  0x7d   : > { %v331_v39 = vadd.f32 %v330_v35, %v1181_v7 }
  0x7e   : > { %v227_v21 = vadd.f32 %v226_v14, %v1179_v10  ;;  %v295_v36 = vadd.f32 %v294_v32, %v264_v49  ;;  %v395_v19 = vadd.f32 %v394_v6, %v364_v31 }
  0x7f   : > { %v332_v2 = vadd.f32 %v331_v39, %v1182_v54 }
  0x80   : > { %v228_v59 = vrot.slane %v227_v21, 4  ;;  %v296_v37 = vadd.f32 %v295_v36, %v265_v50  ;;  %v396_v62 = vadd.f32 %v395_v19, %v365_v1 }
  0x81   : > { %v333_v20 = vadd.f32 %v332_v2, %v1183_v23 }
  0x82   : > { %v229_v40 = vadd.f32 %v228_v59, %v227_v21  ;;  %v297_v41 = vrot.slane %v296_v37, 4  ;;  %v397_v8 = vadd.f32 %v396_v62, %v366_v22 }
  0x83   : > { %v334_v3 = vrot.slane %v333_v20, 4 }
  0x84   : > { %v230_v60 = vrot.slane %v229_v40, 2  ;;  %v298_v58 = vadd.f32 %v297_v41, %v296_v37  ;;  %v398_v42 = vadd.f32 %v397_v8, %v367_v11 }
  0x85   : > { %v335_v27 = vadd.f32 %v334_v3, %v333_v20 }
  0x86   : > { %v299_v24 = vrot.slane %v298_v58, 2  ;;  %v399_v12 = vadd.f32 %v398_v42, %v368_v38  ;;  %v231_v61 = vadd.f32 %v230_v60, %v229_v40 }
  0x87   : > { %v336_v46 = vrot.slane %v335_v27, 2 }
  0x88   : > { %v300_v43 = vadd.f32 %v299_v24, %v298_v58  ;;  %v400_v28 = vadd.f32 %v399_v12, %v369_v45  ;;  %v232_v55 = vrot.slane %v231_v61, 1 }
  0x89   : > { %v337_v53 = vadd.f32 %v336_v46, %v335_v27 }
  0x8a   : > { %v401_v25 = vadd.f32 %v400_v28, %v370_v15  ;;  %v301_v47 = vrot.slane %v300_v43, 1  ;;  %v233_v29 = vadd.f32 %v232_v55, %v231_v61 }
  0x8b   : > { %v338_v13 = vrot.slane %v337_v53, 1 }
  0x8c   : > { %v402_v16 = vadd.f32 %v401_v25, %v371_v4  ;;  %v302_v26 = vadd.f32 %v301_v47, %v300_v43 }
  0x8d   : > { %v339_v51 = vadd.f32 %v338_v13, %v337_v53 }
  0x8e   : > { %v403_v44 = vrot.slane %v402_v16, 4  ;;  %v410_v48 = vsel %vm409_vm0, %v233_v29, %v302_v26 }
  0x8f   : > { %v412_v33 = vsel %vm411_vm1, %v410_v48, %v339_v51 }
  0x90   : > { %v404_v5 = vadd.f32 %v403_v44, %v402_v16 }
  0x92   : > { %v405_v57 = vrot.slane %v404_v5, 2 }
  0x94   : > { %v406_v52 = vadd.f32 %v405_v57, %v404_v5 }
  0x96   : > { %v407_v63 = vrot.slane %v406_v52, 1 }
  0x98   : > { %v408_v17 = vadd.f32 %v407_v63, %v406_v52 }
  0x99   : > { %420 = sbr.rel (%p492_p7) target bundleno = 166 (0xa6), region = 36 }
  0x9a   : > { %v414_v14 = vsel %vm413_vm2, %v412_v33, %v408_v17 }
  0x9b   : > { %v415_v9 = vadd.f32 %v414_v14, %v196_v30 }
  0x9d   : > { %416 = vst [vmem:[#allocation2] sm:$0xf] %v415_v9 }
  0xa4   : > { %v421_v56 = vld [vmem:[#allocation2] sm:$0xf] }
  0xa5   : > { %422 = vst [vmem:[#allocation6] sm:$0xf] %v421_v56 }
  0xa6 PF: > { %p510_p8 = scmp.eq.s32.totalorder %s679_s10, 1  ;;  %s649_s9 = smov [#allocation6]  }
  0xa7   : > { %s429_s16 = sshll.u32 %s649_s9, 4  ;;  %s431_s21 = sshll.u32 %s1140_s1, 4  ;;  %s430_s16 = int_to_ptr.vmem [resolvable:$true] %s429_s16  ;;  %s432_s21 = int_to_ptr.hbm [resolvable:$true] %s431_s21 }
  0xa8   : > { %502 = dma.vmem_to_hbm [thread:$0]  (%p510_p8), %s430_s16, 64, %s432_s21, [#allocation5]  }
  0xa9   : > { %627 = dma.done.wait (%p510_p8), [#allocation5], 64  }
  0xaa   : > { %629 = vsyncadd (%p510_p8), [#allocation5], 4294967232 }
  0xab PF: > { %p12_p9 = scmp.ge.s32.totalorder %s682_s11, 4   ;;  %s1184_s6 = smov %s636_s7 }
  0xac   : > { %s1185_s7 = smov %s640_s8  ;;  %s1186_s8 = smov %s692_s14 }
  0xad   : > { %s1187_s9 = smov %s682_s11  ;;  %14 = sbr.rel (!%p12_p9) target bundleno = 4 (0x4), region = 69 }
  0xb2   :  { %445 = vsyncpa [#allocation4], 1 }
  0xb3   :  { %447 = vsyncpa [#allocation4 + $0x1], 1 }
  0xb4   :  { %448 = vsyncpa [#allocation5], 1 }
  0xb5   :  { %450 = vsyncpa [#allocation5 + $0x1], 1 }

</bundles_post_ra>
